<compile_context>
chip_gen: v6e
topology: v6e:2x2x1
jax: 0.10.0
libtpu: 0.0.40
codegen_flags: <defaults>
</compile_context>

<pallas_src>
import math
import functools

import jax
import jax.numpy as jnp
from jax import lax
from jax.experimental import pallas as pl
from jax.experimental.pallas import tpu as pltpu

LN_EPS = 1e-5
VMEM_LIMIT_BYTES = 32 * 1024 * 1024   # explicit scoped-VMEM budget (safe on v5e/v6e/v7x)


# ------------------------------ small helpers -------------------------------

def _round_up(x, m):
    return ((x + m - 1) // m) * m


def _pad_rows(x, mp):
    m = x.shape[0]
    if mp == m:
        return x
    return jnp.pad(x, [(0, mp - m)] + [(0, 0)] * (x.ndim - 1))


def _bf16(x):
    return x.astype(jnp.bfloat16)


def _ln(x, w, b, eps):
    """LayerNorm over the last dim (f32 statistics). Usable inside kernels."""
    mean = jnp.mean(x, axis=-1, keepdims=True)
    xc = x - mean
    var = jnp.mean(xc * xc, axis=-1, keepdims=True)
    return xc * lax.rsqrt(var + eps) * w + b


def _choose_tile(M, row_tile):
    """Pick a row tile: full rows if small, else prefer a divisor of M
    (multiple of 8, >= row_tile/2) so no jnp.pad round-trip is needed."""
    if M <= row_tile:
        return _round_up(M, 8)
    lo = max(row_tile // 2, 8)
    for tm in range(row_tile, lo - 1, -8):
        if M % tm == 0:
            return tm
    return row_tile


# ------------------------------ Pallas kernels -------------------------------
# All kernels keep f32 accumulation / normalization; matmul operands are bf16.

def _linear_kernel(x_ref, w_ref, b_ref, o_ref):
    y = jnp.dot(_bf16(x_ref[...]), w_ref[...],
                preferred_element_type=jnp.float32) + b_ref[...]
    o_ref[...] = y.astype(o_ref.dtype)


def _mlp2_kernel(x_ref, w1_ref, b1_ref, w2_ref, b2_ref, o_ref):
    """Fused 2-layer MLP (ReLU between) -- ref_point_head."""
    h = jnp.maximum(jnp.dot(_bf16(x_ref[...]), w1_ref[...],
                            preferred_element_type=jnp.float32) + b1_ref[...], 0.0)
    y = jnp.dot(_bf16(h), w2_ref[...],
                preferred_element_type=jnp.float32) + b2_ref[...]
    o_ref[...] = y.astype(o_ref.dtype)


def _bbox_kernel(x_ref, ris_ref, w1_ref, b1_ref, w2_ref, b2_ref, w3_ref, b3_ref,
                 o_ref):
    """Fused 3-layer bbox MLP + inverse-sigmoid residual + sigmoid epilogue."""
    h = jnp.maximum(jnp.dot(_bf16(x_ref[...]), w1_ref[...],
                            preferred_element_type=jnp.float32) + b1_ref[...], 0.0)
    h = jnp.maximum(jnp.dot(_bf16(h), w2_ref[...],
                            preferred_element_type=jnp.float32) + b2_ref[...], 0.0)
    delta = jnp.dot(_bf16(h), w3_ref[...],
                    preferred_element_type=jnp.float32) + b3_ref[...]
    unsig = delta + ris_ref[...]
    o_ref[...] = (1.0 / (1.0 + jnp.exp(-unsig))).astype(o_ref.dtype)


def _ffn_block_kernel(x_ref, w1_ref, b1_ref, w2_ref, b2_ref,
                      ln3_w_ref, ln3_b_ref, nrm_w_ref, nrm_b_ref,
                      o_ref, inter_ref, *, eps):
    """linear1 -> ReLU -> linear2 -> +residual -> norm3, plus the decoder-level
    LayerNorm of the result (the `intermediate` output) in the same kernel."""
    x = x_ref[...]
    h = jnp.maximum(jnp.dot(_bf16(x), w1_ref[...],
                            preferred_element_type=jnp.float32) + b1_ref[...], 0.0)
    y = x + jnp.dot(_bf16(h), w2_ref[...],
                    preferred_element_type=jnp.float32) + b2_ref[...]
    t = _ln(y, ln3_w_ref[...], ln3_b_ref[...], eps)
    o_ref[...] = t
    inter_ref[...] = _ln(t, nrm_w_ref[...], nrm_b_ref[...], eps)


def _offaw_kernel(x_ref, refc_ref, refwh_ref, w_ref, b_ref, loc_ref, aw_ref,
                  *, nhead, n_off, n_grp, off_scale):
    """Fused sampling-offset / attention-weight projection with the per-head
    group softmax and the sampling-location math fused into the epilogue."""
    proj = jnp.dot(_bf16(x_ref[...]), w_ref[...],
                   preferred_element_type=jnp.float32) + b_ref[...]
    off = proj[:, :n_off]
    loc_ref[...] = refc_ref[...] + off * off_scale * refwh_ref[...]
    logits = proj[:, n_off:]
    aw_parts = []
    for h in range(nhead):                     # static unroll: per-head group softmax
        g = logits[:, h * n_grp:(h + 1) * n_grp]
        g = g - jnp.max(g, axis=-1, keepdims=True)
        e = jnp.exp(g)
        aw_parts.append(e / jnp.sum(e, axis=-1, keepdims=True))
    aw_ref[...] = jnp.concatenate(aw_parts, axis=-1)


def _ca_agg_kernel(g_ref, w_ref, tgt_ref, wo_ref, bo_ref, lnw_ref, lnb_ref,
                   o_ref, *, nhead, eps):
    """Deformable-attn weighted aggregation of gathered value rows (bf16) with
    compact per-head weights (tm, P, nhead), + output projection + residual +
    LayerNorm (norm1)."""
    g = g_ref[...]                             # (tm, P, d)  bf16
    w = w_ref[...]                             # (tm, P, nhead) f32
    d = g.shape[-1]
    dh = d // nhead
    parts = []
    for h in range(nhead):                     # static unroll: broadcast weight over dh
        g_h = g[:, :, h * dh:(h + 1) * dh].astype(jnp.float32)
        w_h = w[:, :, h:h + 1]
        parts.append(jnp.sum(g_h * w_h, axis=1))            # (tm, dh)
    agg = jnp.concatenate(parts, axis=-1)                    # (tm, d)
    proj = jnp.dot(_bf16(agg), wo_ref[...],
                   preferred_element_type=jnp.float32) + bo_ref[...]
    y = tgt_ref[...] + proj
    o_ref[...] = _ln(y, lnw_ref[...], lnb_ref[...], eps)


def _sa_block_kernel(qkin_ref, tgt_ref, wqk_ref, bqk_ref, wv_ref, bv_ref,
                     wo_ref, bo_ref, lnw_ref, lnb_ref, o_ref, *, nhead, eps):
    """Fused multi-head self-attention block for one batch element:
    full-width Q/K + V projections, per-head softmax attention on lane slices,
    single full-width output projection, residual + LayerNorm (norm2)."""
    x_qk = qkin_ref[0]                        # (nq, d)  q/k input = tgt + query_pos
    x_v = tgt_ref[0]                          # (nq, d)  v input / residual = tgt
    nq, d = x_v.shape
    dh = d // nhead
    scale = 1.0 / math.sqrt(dh)

    qk = jnp.dot(_bf16(x_qk), wqk_ref[...],
                 preferred_element_type=jnp.float32) + bqk_ref[...]     # (nq, 2d)
    v = jnp.dot(_bf16(x_v), wv_ref[...],
                preferred_element_type=jnp.float32) + bv_ref[...]       # (nq, d)
    qk16 = _bf16(qk)
    v16 = _bf16(v)

    head_outs = []
    for h in range(nhead):                    # static unroll over heads
        q_h = qk16[:, h * dh:(h + 1) * dh]
        k_h = qk16[:, d + h * dh:d + (h + 1) * dh]
        v_h = v16[:, h * dh:(h + 1) * dh]
        s = lax.dot_general(q_h, k_h, (((1,), (1,)), ((), ())),
                            preferred_element_type=jnp.float32) * scale
        s = s - jnp.max(s, axis=-1, keepdims=True)
        p = jnp.exp(s)
        p = p / jnp.sum(p, axis=-1, keepdims=True)           # exact softmax
        head_outs.append(jnp.dot(_bf16(p), v_h, preferred_element_type=jnp.float32))
    attn = jnp.concatenate(head_outs, axis=-1)                # (nq, d)
    proj = jnp.dot(_bf16(attn), wo_ref[...],
                   preferred_element_type=jnp.float32) + bo_ref[...]
    y = x_v + proj
    o_ref[0] = _ln(y, lnw_ref[...], lnb_ref[...], eps)


# ------------------------- row-tiled pallas_call glue ------------------------

def _row_pallas(kernel, row_inputs, weight_inputs, out_trailing, out_dtypes=None,
                *, row_tile=256):
    """Run a row-wise fused kernel, tiling the leading (row) dim over the grid.
    `row_inputs` share the leading dim M and are tiled; `weight_inputs` are
    broadcast to every tile.  Outputs have shapes (M, *trailing)."""
    M = row_inputs[0].shape[0]
    tm = _choose_tile(M, row_tile)
    Mp = _round_up(M, tm)
    grid = (Mp // tm,)
    padded = [_pad_rows(x, Mp) for x in row_inputs]
    if out_dtypes is None:
        out_dtypes = [jnp.float32] * len(out_trailing)

    in_specs = []
    for x in padded:
        nt = x.ndim - 1
        in_specs.append(pl.BlockSpec((tm,) + x.shape[1:],
                                     lambda i, nt=nt: (i,) + (0,) * nt))
    for w in weight_inputs:
        nb = w.ndim
        in_specs.append(pl.BlockSpec(w.shape, lambda i, nb=nb: (0,) * nb))

    out_shape = tuple(jax.ShapeDtypeStruct((Mp,) + tuple(t), dt)
                      for t, dt in zip(out_trailing, out_dtypes))
    out_specs = tuple(pl.BlockSpec((tm,) + tuple(t),
                                   lambda i, nt=len(t): (i,) + (0,) * nt)
                      for t in out_trailing)
    single = len(out_trailing) == 1
    res = pl.pallas_call(
        kernel,
        out_shape=out_shape[0] if single else out_shape,
        grid=grid,
        in_specs=in_specs,
        out_specs=out_specs[0] if single else list(out_specs),
        compiler_params=pltpu.CompilerParams(
            dimension_semantics=("parallel",),
            vmem_limit_bytes=VMEM_LIMIT_BYTES),
    )(*padded, *weight_inputs)
    outs = (res,) if single else tuple(res)
    outs = tuple(o[:M] for o in outs)
    return outs[0] if single else outs


# ------------------------------- block wrappers ------------------------------

def pallas_sa_block(q_in, tgt, lp, nhead, eps=LN_EPS):
    """nn.MultiheadAttention(q_in, q_in, tgt) + residual(tgt) + LayerNorm(norm2).
    q_in / tgt: (nq, bs, d) seq-first.  Grid over batch ('parallel')."""
    nq, bs, d = tgt.shape

    w_qk = _bf16(jnp.concatenate([lp["sa_q"]["w"], lp["sa_k"]["w"]], axis=1))   # (d, 2d)
    b_qk = jnp.concatenate([lp["sa_q"]["b"], lp["sa_k"]["b"]], axis=1)          # (1, 2d)
    w_v = _bf16(lp["sa_v"]["w"])
    b_v = lp["sa_v"]["b"]
    w_o = _bf16(lp["sa_o"]["w"])
    b_o = lp["sa_o"]["b"]
    lnw = lp["norm2"]["w"].reshape(1, d)
    lnb = lp["norm2"]["b"].reshape(1, d)

    q_b = jnp.swapaxes(q_in, 0, 1).astype(jnp.float32)   # (bs, nq, d)
    t_b = jnp.swapaxes(tgt, 0, 1)

    out = pl.pallas_call(
        functools.partial(_sa_block_kernel, nhead=nhead, eps=eps),
        out_shape=jax.ShapeDtypeStruct((bs, nq, d), jnp.float32),
        grid=(bs,),
        in_specs=[pl.BlockSpec((1, nq, d), lambda b: (b, 0, 0)),
                  pl.BlockSpec((1, nq, d), lambda b: (b, 0, 0)),
                  pl.BlockSpec(w_qk.shape, lambda b: (0, 0)),
                  pl.BlockSpec(b_qk.shape, lambda b: (0, 0)),
                  pl.BlockSpec(w_v.shape, lambda b: (0, 0)),
                  pl.BlockSpec(b_v.shape, lambda b: (0, 0)),
                  pl.BlockSpec(w_o.shape, lambda b: (0, 0)),
                  pl.BlockSpec(b_o.shape, lambda b: (0, 0)),
                  pl.BlockSpec(lnw.shape, lambda b: (0, 0)),
                  pl.BlockSpec(lnb.shape, lambda b: (0, 0))],
        out_specs=pl.BlockSpec((1, nq, d), lambda b: (b, 0, 0)),
        compiler_params=pltpu.CompilerParams(
            dimension_semantics=("parallel",),
            vmem_limit_bytes=VMEM_LIMIT_BYTES),
    )(q_b, t_b, w_qk, b_qk, w_v, b_v, w_o, b_o, lnw, lnb)
    return jnp.swapaxes(out, 0, 1)


def cross_attention_block(lp, tgt, query, ref_input, memory, spatial_shapes,
                          nhead, n_points, eps=LN_EPS):
    """MSDeformAttn (query_dim=4 branch, no padding mask) + residual + norm1.
    tgt/query: (nq, bs, d); ref_input: (nq, bs, nl, 4); memory: (hw, bs, d)."""
    nq, bs, d = tgt.shape
    dh = d // nhead
    nl = len(spatial_shapes)
    hw = memory.shape[0]
    n_off = nhead * nl * n_points * 2
    n_aw = nhead * nl * n_points
    n_grp = nl * n_points

    # value projection (Pallas, row-tiled over hw*bs rows, bf16 output).  Rows
    # stay in the native (hw, bs) order -> no XLA transpose of the value slab.
    val_rows = _row_pallas(_linear_kernel, [memory.reshape(hw * bs, d)],
                           [_bf16(lp["ca_value"]["w"]), lp["ca_value"]["b"]],
                           out_trailing=[(d,)], out_dtypes=[jnp.bfloat16])
    value_flat = val_rows.reshape(hw * bs, nhead, dh)     # global row = spatial*bs + b

    # fused sampling-offset + attention-weight projection (one matmul), with the
    # per-head group softmax and sampling-location math done in the kernel.
    w_cat = _bf16(jnp.concatenate([lp["ca_off"]["w"], lp["ca_attn"]["w"]], axis=1))
    b_cat = jnp.concatenate([lp["ca_off"]["b"], lp["ca_attn"]["b"]], axis=1)
    q_rows = query.reshape(nq * bs, d).astype(jnp.float32)
    ref_r = ref_input.reshape(nq * bs, nl, 4)
    refc = jnp.broadcast_to(ref_r[:, None, :, None, :2],
                            (nq * bs, nhead, nl, n_points, 2)).reshape(nq * bs, n_off)
    refwh = jnp.broadcast_to(ref_r[:, None, :, None, 2:],
                             (nq * bs, nhead, nl, n_points, 2)).reshape(nq * bs, n_off)
    loc_rows, aw_rows = _row_pallas(
        functools.partial(_offaw_kernel, nhead=nhead, n_off=n_off, n_grp=n_grp,
                          off_scale=0.5 / n_points),
        [q_rows, refc, refwh], [w_cat, b_cat],
        out_trailing=[(n_off,), (n_aw,)])
    loc = loc_rows.reshape(nq, bs, nhead, nl, n_points, 2)
    aw = aw_rows.reshape(nq, bs, nhead, nl, n_points)

    # bilinear corner indices / weights (grid_sample align_corners=False, zeros)
    idx_list, w_list = [], []
    start = 0
    for lid, (H, W) in enumerate(spatial_shapes):
        px = loc[:, :, :, lid, :, 0] * W - 0.5            # (nq, bs, nhead, n_points)
        py = loc[:, :, :, lid, :, 1] * H - 0.5
        x0 = jnp.floor(px)
        y0 = jnp.floor(py)
        for dy in (0.0, 1.0):
            for dx in (0.0, 1.0):
                xc = x0 + dx
                yc = y0 + dy
                wgt = (1.0 - jnp.abs(px - xc)) * (1.0 - jnp.abs(py - yc))
                valid = ((xc >= 0) & (xc <= W - 1) &
                         (yc >= 0) & (yc <= H - 1)).astype(jnp.float32)
                w_list.append(aw[:, :, :, lid, :] * wgt * valid)
                xi = jnp.clip(xc, 0, W - 1).astype(jnp.int32)
                yi = jnp.clip(yc, 0, H - 1).astype(jnp.int32)
                idx_list.append(start + yi * W + xi)
        start += H * W

    P = 4 * nl * n_points
    idx = jnp.stack(idx_list, axis=3).reshape(nq, bs, nhead, P)
    wts = jnp.stack(w_list, axis=3).reshape(nq, bs, nhead, P)

    # TODO(synk): the bilinear gather itself remains an XLA take_along_axis
    # (no clean in-kernel TPU Pallas dynamic row gather over an hw-sized slab);
    # it gathers only the sampled rows and in bf16.
    b_ids = jnp.arange(bs, dtype=jnp.int32).reshape(1, bs, 1, 1)
    gidx = idx * bs + b_ids                                              # global row index
    gidx_t = jnp.transpose(gidx, (0, 1, 3, 2)).reshape(nq * bs * P, nhead, 1)
    gathered = jnp.take_along_axis(value_flat, gidx_t, axis=0)           # (nq*bs*P, nhead, dh) bf16
    gathered = gathered.reshape(nq * bs, P, d)                           # head-major channel fold
    wts_c = jnp.transpose(wts, (0, 1, 3, 2)).reshape(nq * bs, P, nhead)  # compact weights

    tgt_rows = tgt.reshape(nq * bs, d)
    out_rows = _row_pallas(
        functools.partial(_ca_agg_kernel, nhead=nhead, eps=eps),
        [gathered, wts_c, tgt_rows],
        [_bf16(lp["ca_out"]["w"]), lp["ca_out"]["b"],
         lp["norm1"]["w"].reshape(1, d), lp["norm1"]["b"].reshape(1, d)],
        out_trailing=[(d,)], row_tile=128)
    return out_rows.reshape(nq, bs, d)


def ffn_block(lp, norm_params, tgt, eps=LN_EPS):
    """Fused FFN + residual + norm3; also emits the decoder-level norm output."""
    nq, bs, d = tgt.shape
    x = tgt.reshape(nq * bs, d)
    out, inter = _row_pallas(
        functools.partial(_ffn_block_kernel, eps=eps),
        [x],
        [_bf16(lp["ffn1"]["w"]), lp["ffn1"]["b"],
         _bf16(lp["ffn2"]["w"]), lp["ffn2"]["b"],
         lp["norm3"]["w"].reshape(1, d), lp["norm3"]["b"].reshape(1, d),
         norm_params["w"].reshape(1, d), norm_params["b"].reshape(1, d)],
        out_trailing=[(d,), (d,)])
    return out.reshape(nq, bs, d), inter.reshape(nq, bs, d)


# ------------------------------ JAX-side glue --------------------------------

def inverse_sigmoid(x, eps=1e-3):
    x = jnp.clip(x, 0.0, 1.0)
    x1 = jnp.maximum(x, eps)
    x2 = jnp.maximum(1.0 - x, eps)
    return jnp.log(x1 / x2)


def gen_sineembed_for_position(pos, d_model):
    """pos: (nq, bs, 4) -> (nq, bs, 2*d_model). Matches DAB-DETR sine embed."""
    half = d_model // 2
    scale = 2.0 * math.pi
    dim_t = jnp.arange(half, dtype=jnp.float32)
    dim_t = 10000.0 ** (2.0 * jnp.floor(dim_t / 2.0) / half)

    def emb(coord):  # (nq, bs)
        e = coord[..., None] * scale / dim_t  # (nq, bs, half)
        return jnp.stack([jnp.sin(e[..., 0::2]), jnp.cos(e[..., 1::2])],
                         axis=-1).reshape(coord.shape + (half,))

    pos_x = emb(pos[..., 0])
    pos_y = emb(pos[..., 1])
    pos_w = emb(pos[..., 2])
    pos_h = emb(pos[..., 3])
    return jnp.concatenate([pos_y, pos_x, pos_w, pos_h], axis=-1)


def layer_forward(lp, norm_params, tgt, query_pos, ref_input, memory,
                  spatial_shapes, nhead, n_points):
    """DeformableTransformerDecoderLayer with module_seq = ['sa', 'ca', 'ffn']."""
    # --- self attention (fused QKV + attn + out-proj + residual + norm2) ---
    tgt = pallas_sa_block(tgt + query_pos, tgt, lp, nhead)
    # --- deformable cross attention (fused proj/softmax + agg + out-proj + res + norm1) ---
    tgt = cross_attention_block(lp, tgt, tgt + query_pos, ref_input, memory,
                                spatial_shapes, nhead, n_points)
    # --- FFN (fused linear1+ReLU+linear2 + residual + norm3 + decoder norm) ---
    tgt, inter = ffn_block(lp, norm_params, tgt)
    return tgt, inter


def deformable_decoder_forward(params, tgt, memory, reference_points,
                               spatial_shapes, level_start_index, valid_ratios,
                               *, d_model, nhead, n_points):
    """DeformableDecoder.forward (deformable_decoder=True, return_intermediate=True)."""
    del level_start_index  # derived from spatial_shapes inside the CA block
    output = tgt
    nq, bs, _ = tgt.shape
    intermediate = []
    ref_points = [reference_points]

    for lp in params["layers"]:
        vr = jnp.concatenate([valid_ratios, valid_ratios], axis=-1)        # (bs, nl, 4)
        reference_points_input = reference_points[:, :, None, :] * vr[None, :, :, :]
        query_sine_embed = gen_sineembed_for_position(
            reference_points_input[:, :, 0, :], d_model)                    # (nq, bs, 2d)

        # ref_point_head (fused 2-layer MLP) -> query_pos (query_scale is None);
        # written bf16 (it only feeds further matmul inputs).
        qse_rows = query_sine_embed.reshape(nq * bs, -1)
        query_pos = _row_pallas(
            _mlp2_kernel, [qse_rows],
            [_bf16(params["ref_point_head"][0]["w"]), params["ref_point_head"][0]["b"],
             _bf16(params["ref_point_head"][1]["w"]), params["ref_point_head"][1]["b"]],
            out_trailing=[(d_model,)],
            out_dtypes=[jnp.bfloat16]).reshape(nq, bs, d_model)

        output, inter = layer_forward(lp, params["norm"], output, query_pos,
                                      reference_points_input, memory,
                                      spatial_shapes, nhead, n_points)
        intermediate.append(inter)

        # bbox head (fused 3-layer MLP + inverse-sigmoid residual + sigmoid)
        ris = inverse_sigmoid(reference_points).reshape(nq * bs, -1)
        new_ref_rows = _row_pallas(
            _bbox_kernel, [output.reshape(nq * bs, d_model), ris],
            [_bf16(lp["bbox"][0]["w"]), lp["bbox"][0]["b"],
             _bf16(lp["bbox"][1]["w"]), lp["bbox"][1]["b"],
             _bf16(lp["bbox"][2]["w"]), lp["bbox"][2]["b"]],
            out_trailing=[(reference_points.shape[-1],)])
        new_reference_points = new_ref_rows.reshape(nq, bs, -1)
        reference_points = lax.stop_gradient(new_reference_points)          # .detach()
        ref_points.append(new_reference_points)

    return ([jnp.swapaxes(x, 0, 1) for x in intermediate],
            [jnp.swapaxes(r, 0, 1) for r in ref_points])


# ------------------------------ parameter init -------------------------------

def init_params(key, d_model, nhead, num_layers, dim_feedforward,
                n_levels, n_points, query_dim):
    keys = list(jax.random.split(key, 8 + num_layers * 16))
    kit = iter(keys)

    def lin(in_d, out_d, zero_w=False):
        if zero_w:
            w = jnp.zeros((in_d, out_d), jnp.float32)
        else:
            limit = math.sqrt(6.0 / (in_d + out_d))
            w = jax.random.uniform(next(kit), (in_d, out_d), jnp.float32, -limit, limit)
        return {"w": w, "b": jnp.zeros((1, out_d), jnp.float32)}

    def ln(dd):
        return {"w": jnp.ones((dd,), jnp.float32), "b": jnp.zeros((dd,), jnp.float32)}

    # MSDeformAttn sampling_offsets bias grid init (as in MSDeformAttn._reset_parameters)
    thetas = jnp.arange(nhead, dtype=jnp.float32) * (2.0 * math.pi / nhead)
    grid = jnp.stack([jnp.cos(thetas), jnp.sin(thetas)], axis=-1)
    grid = grid / jnp.max(jnp.abs(grid), axis=-1, keepdims=True)
    grid = jnp.tile(grid[:, None, None, :], (1, n_levels, n_points, 1))
    grid = grid * jnp.arange(1, n_points + 1, dtype=jnp.float32)[None, None, :, None]
    off_bias = grid.reshape(1, -1)

    params = {
        "ref_point_head": [lin(query_dim // 2 * d_model, d_model), lin(d_model, d_model)],
        "norm": ln(d_model),
        "layers": [],
    }
    for _ in range(num_layers):
        lp = {
            "sa_q": lin(d_model, d_model), "sa_k": lin(d_model, d_model),
            "sa_v": lin(d_model, d_model), "sa_o": lin(d_model, d_model),
            "norm2": ln(d_model),
            "ca_off": lin(d_model, nhead * n_levels * n_points * 2, zero_w=True),
            "ca_attn": lin(d_model, nhead * n_levels * n_points, zero_w=True),
            "ca_value": lin(d_model, d_model),
            "ca_out": lin(d_model, d_model),
            "norm1": ln(d_model),
            "ffn1": lin(d_model, dim_feedforward),
            "ffn2": lin(dim_feedforward, d_model),
            "norm3": ln(d_model),
            "bbox": [lin(d_model, d_model), lin(d_model, d_model), lin(d_model, 4)],
        }
        lp["ca_off"]["b"] = off_bias
        params["layers"].append(lp)
    return params


# ----------------------------------- main ------------------------------------

if __name__ == "__main__":
    d_model, nhead, num_layers, dim_feedforward = 32, 4, 2, 64
    n_levels, n_points, query_dim = 1, 2, 4
    nq, bs = 8, 2
    spatial_shapes = ((8, 8),)                    # static per-level (H, W)
    hw = sum(h * w for h, w in spatial_shapes)
    level_start_index = (0,)

    key = jax.random.PRNGKey(0)
    k1, k2, k3, kp = jax.random.split(key, 4)
    tgt = jax.random.normal(k1, (nq, bs, d_model), jnp.float32)
    memory = jax.random.normal(k2, (hw, bs, d_model), jnp.float32)
    reference_points = jax.random.uniform(k3, (nq, bs, query_dim), jnp.float32, 0.1, 0.9)
    valid_ratios = jnp.ones((bs, n_levels, 2), jnp.float32)

    params = init_params(kp, d_model, nhead, num_layers, dim_feedforward,
                         n_levels, n_points, query_dim)

    intermediate, ref_points = deformable_decoder_forward(
        params, tgt, memory, reference_points,
        spatial_shapes, level_start_index, valid_ratios,
        d_model=d_model, nhead=nhead, n_points=n_points)

    jax.block_until_ready(intermediate)
    jax.block_until_ready(ref_points)

    assert len(intermediate) == num_layers
    assert len(ref_points) == num_layers + 1
    assert intermediate[0].shape == (bs, nq, d_model)
    assert ref_points[-1].shape == (bs, nq, query_dim)
    assert all(bool(jnp.all(jnp.isfinite(x))) for x in intermediate + ref_points)

    print("KERNEL_OK")
</pallas_src>

<mosaic_0001>
module attributes {stable_mosaic.version = 11 : i64} {
  func.func @_mlp2_kernel(%arg0: i32, %arg1: memref<16x64xf32, #tpu.memory_space<vmem>>, %arg2: memref<64x32xbf16, #tpu.memory_space<vmem>>, %arg3: memref<1x32xf32, #tpu.memory_space<vmem>>, %arg4: memref<32x32xbf16, #tpu.memory_space<vmem>>, %arg5: memref<1x32xf32, #tpu.memory_space<vmem>>, %arg6: memref<16x32xbf16, #tpu.memory_space<vmem>>) attributes {dimension_semantics = [#tpu.dimension_semantics<parallel>], iteration_bounds = array<i64: 1>, scalar_prefetch = 0 : i64, scratch_operands = 0 : i64, tpu.core_type = #tpu.core_type<tc>, window_params = [{transform_indices = @transform_0, window_bounds = array<i64: 16, 64>}, {pipeline_mode = #tpu.pipeline_mode<synchronous>, transform_indices = @transform_1, window_bounds = array<i64: 64, 32>}, {pipeline_mode = #tpu.pipeline_mode<synchronous>, transform_indices = @transform_2, window_bounds = array<i64: 1, 32>}, {pipeline_mode = #tpu.pipeline_mode<synchronous>, transform_indices = @transform_3, window_bounds = array<i64: 32, 32>}, {pipeline_mode = #tpu.pipeline_mode<synchronous>, transform_indices = @transform_4, window_bounds = array<i64: 1, 32>}, {transform_indices = @transform_5, window_bounds = array<i64: 16, 32>}]} {
    %c0 = arith.constant 0 : index
    %c0_0 = arith.constant 0 : index
    %0 = vector.load %arg1[%c0, %c0_0] : memref<16x64xf32, #tpu.memory_space<vmem>>, vector<16x64xf32>
    %1 = arith.truncf %0 : vector<16x64xf32> to vector<16x64xbf16>
    %c0_1 = arith.constant 0 : index
    %c0_2 = arith.constant 0 : index
    %2 = vector.load %arg2[%c0_1, %c0_2] : memref<64x32xbf16, #tpu.memory_space<vmem>>, vector<64x32xbf16>
    %cst = arith.constant dense<0.000000e+00> : vector<16x32xf32>
    %3 = tpu.matmul %1, %2, %cst {dimension_numbers = #tpu.dot_dimension_numbers<[1], [0], [0], [1], [0, 0, 1, 1], [], []>} : vector<16x64xbf16>, vector<64x32xbf16>, vector<16x32xf32> -> vector<16x32xf32>
    %c0_3 = arith.constant 0 : index
    %c0_4 = arith.constant 0 : index
    %4 = vector.load %arg3[%c0_3, %c0_4] : memref<1x32xf32, #tpu.memory_space<vmem>>, vector<1x32xf32>
    %5 = vector.broadcast %4 : vector<1x32xf32> to vector<16x32xf32>
    %6 = arith.addf %3, %5 : vector<16x32xf32>
    %cst_5 = arith.constant 0.000000e+00 : f32
    %7 = vector.broadcast %cst_5 : f32 to vector<16x32xf32>
    %8 = arith.maximumf %6, %7 : vector<16x32xf32>
    %9 = arith.truncf %8 : vector<16x32xf32> to vector<16x32xbf16>
    %c0_6 = arith.constant 0 : index
    %c0_7 = arith.constant 0 : index
    %10 = vector.load %arg4[%c0_6, %c0_7] : memref<32x32xbf16, #tpu.memory_space<vmem>>, vector<32x32xbf16>
    %cst_8 = arith.constant dense<0.000000e+00> : vector<16x32xf32>
    %11 = tpu.matmul %9, %10, %cst_8 {dimension_numbers = #tpu.dot_dimension_numbers<[1], [0], [0], [1], [0, 0, 1, 1], [], []>} : vector<16x32xbf16>, vector<32x32xbf16>, vector<16x32xf32> -> vector<16x32xf32>
    %c0_9 = arith.constant 0 : index
    %c0_10 = arith.constant 0 : index
    %12 = vector.load %arg5[%c0_9, %c0_10] : memref<1x32xf32, #tpu.memory_space<vmem>>, vector<1x32xf32>
    %13 = vector.broadcast %12 : vector<1x32xf32> to vector<16x32xf32>
    %14 = arith.addf %11, %13 : vector<16x32xf32>
    %15 = arith.truncf %14 : vector<16x32xf32> to vector<16x32xbf16>
    %c0_11 = arith.constant 0 : index
    %c0_12 = arith.constant 0 : index
    %16 = vector.load %arg6[%c0_11, %c0_12] : memref<16x32xbf16, #tpu.memory_space<vmem>>, vector<16x32xbf16>
    tpu.vector_store %arg6[%c0_11, %c0_12], %15 {strides = array<i32>} : memref<16x32xbf16, #tpu.memory_space<vmem>>, vector<16x32xbf16>,
    return
  }
  func.func @transform_0(%arg0: i32) -> (i32, i32) {
    %c0_i32 = arith.constant 0 : i32
    %c0_i32_0 = arith.constant 0 : i32
    return %arg0, %c0_i32 : i32, i32
  }
  func.func @transform_1(%arg0: i32) -> (i32, i32) {
    %c0_i32 = arith.constant 0 : i32
    %c0_i32_0 = arith.constant 0 : i32
    %c0_i32_1 = arith.constant 0 : i32
    return %c0_i32, %c0_i32_0 : i32, i32
  }
  func.func @transform_2(%arg0: i32) -> (i32, i32) {
    %c0_i32 = arith.constant 0 : i32
    %c0_i32_0 = arith.constant 0 : i32
    %c0_i32_1 = arith.constant 0 : i32
    return %c0_i32, %c0_i32_0 : i32, i32
  }
  func.func @transform_3(%arg0: i32) -> (i32, i32) {
    %c0_i32 = arith.constant 0 : i32
    %c0_i32_0 = arith.constant 0 : i32
    %c0_i32_1 = arith.constant 0 : i32
    return %c0_i32, %c0_i32_0 : i32, i32
  }
  func.func @transform_4(%arg0: i32) -> (i32, i32) {
    %c0_i32 = arith.constant 0 : i32
    %c0_i32_0 = arith.constant 0 : i32
    %c0_i32_1 = arith.constant 0 : i32
    return %c0_i32, %c0_i32_0 : i32, i32
  }
  func.func @transform_5(%arg0: i32) -> (i32, i32) {
    %c0_i32 = arith.constant 0 : i32
    %c0_i32_0 = arith.constant 0 : i32
    return %arg0, %c0_i32 : i32, i32
  }
}

</mosaic_0001>

<bundles_post_ra>
// kernel: tpu_custom_call.1
= control target key start
LH: loop header
LB: loop body
LE: loop exit
PB: predicated region body
PF: predicated region fallthrough
CT: control target
= control target key end

     0   :  { %v282_v1 = vmov 0.0   ;;  %vm283_vm0 = vmmov 0   ;;  %s350_s0 = inlined_call_operand.vmem [shape: f32[16,64], index: 0, kind: input, shape index: {}]   ;;  %s351_s1 = inlined_call_operand.vmem [shape: bf16[64,32], index: 1, kind: input, shape index: {}]   ;;  %s352_s2 = inlined_call_operand.vmem [shape: f32[1,32], index: 2, kind: input, shape index: {}]   ;;  %s353_s3 = inlined_call_operand.vmem [shape: bf16[32,32], index: 3, kind: input, shape index: {}]   ;;  %s354_s4 = inlined_call_operand.vmem [shape: f32[1,32], index: 4, kind: input, shape index: {}]   ;;  %s355_s5 = inlined_call_operand.hbm [shape: bf16[16,32], index: 5, kind: output, shape index: {}]  }
   0x1   :  { %v254_v0 = vld [vmem:[%s351_s1 + $0x18] sm:$0xff]   ;;  %229 = vmatprep.subr.bf16.mxu0 %v282_v1  ;;  %241 = vmatprep.subr.bf16.mxu1 %v282_v1  ;;  %v255_v2 = vld [vmem:[%s351_s1 + $0x10] sm:$0xff]   ;;  %v256_v3 = vld [vmem:[%s351_s1 + $0x8] sm:$0xff]  }
   0x2   :  { %230 = vmatpush3.bf16.msra.mxu0 %v254_v0  ;;  %237 = vmatprep.mubr.msk.bf16.mxu0 %vm283_vm0, %v282_v1 }
   0x3   :  { %231 = vmatprep.subr.bf16.mxu0 %v282_v1  ;;  %245 = vmatprep.mubr.msk.bf16.mxu1 %vm283_vm0, %v282_v1 }
   0x6   :  { %232 = vmatpush3.bf16.msra.mxu0 %v255_v2 }
   0x7   :  { %10 = vsyncpa [#allocation3], 0  ;;  %233 = vmatprep.subr.bf16.mxu0 %v282_v1  ;;  %v257_v4 = vld [vmem:[%s351_s1] sm:$0xff]   ;;  %v23_v6 = vld [vmem:[%s350_s0 + $0x8] sm:$0xff]  ;;  %vm64_vm1 = vcmask 523264   ;;  %vm135_vm2 = vcmask 261120  }
   0x8   :  { %v22_v5 = vld [vmem:[%s350_s0] sm:$0xff]  ;;  %v258_v8 = vld [vmem:[%s353_s3 + $0x8] sm:$0xff]   ;;  %vm188_vm3 = vcmask 257024  }
   0x9   :  { %v24_v7 = vpack.c.bf16 %v23_v6, %v22_v5  ;;  %242 = vmatpush3.bf16.msra.mxu1 %v258_v8  ;;  %v259_v9 = vld [vmem:[%s353_s3] sm:$0xff]  }
   0xa   :  { %234 = vmatpush3.bf16.msra.mxu0 %v256_v3  ;;  %243 = vmatprep.subr.bf16.mxu1 %v282_v1  ;;  %v207_v10 = vld [vmem:[%s352_s2] ss:$0 sm:$0xff]  ;;  %s284_s2 = smov [#allocation2]  }
   0xb   :  { %235 = vmatprep.subr.bf16.mxu0 %v282_v1  ;;  %v213_v20 = vld [vmem:[%s354_s4] ss:$0 sm:$0xff]  ;;  %s196_s3 = sshll.u32 %s284_s2, 4  ;;  %s197_s3 = int_to_ptr.vmem [resolvable:$true] %s196_s3 }
   0xc   :  { %s260_s11 = scalar_lea.vmem %s197_s3, 128  ;;  %p265_p1 = scmp.lt.s32.totalorder %s197_s3, %s197_s3 }
   0xd   :  { %244 = vmatpush3.bf16.msra.mxu1 %v259_v9  ;;  %p261_p0 = scmp.ne.s32.totalorder %s197_s3, %s260_s11  ;;  %p266_p2 = scmp.lt.s32.totalorder %s260_s11, %s260_s11 }
   0xe   :  { %236 = vmatpush3.bf16.msra.mxu0 %v257_v4 }
   0xf   :  { %p267_p3 = por %p266_p2, %p265_p1 }
  0x11   :  { %238 = vmatmul.mubr.msk.bf16.vlgmr.msra.gmra.mxu0 %vm64_vm1, %v24_v7  ;;  %p268_p4 = pnand %p267_p3, %p261_p0 }
  0xd1   :  { %v102_v11 = vpop.f32.mrf.mxu0 }
  0xd2   :  { %v103_v13 = vadd.f32 %v207_v10, %v102_v11 }
  0xd3   :  { %v239_v12 = vpop.f32.mrf.mxu0 }
  0xd4   :  { %v109_v17 = vmax.f32 %v103_v13, 0.0 }
  0xd5   :  { %v105_v14 = vpop.f32.mrf.mxu0 }
  0xd6   :  { %v106_v15 = vadd.f32 %v207_v10, %v105_v14 }
  0xd7   :  { %v240_v16 = vpop.f32.mrf.mxu0 }
  0xd8   :  { %v110_v18 = vmax.f32 %v106_v15, 0.0 }
  0xda   :  { %v111_v19 = vpack.c.bf16 %v110_v18, %v109_v17 }
  0xdc   :  { %246 = vmatmul.mubr.msk.bf16.vlgmr.msra.gmra.mxu1 %vm135_vm2, %v111_v19 }
 0x19c   :  { %v173_v21 = vpop.f32.mrf.mxu1 }
 0x19d   :  { %v174_v22 = vadd.f32 %v213_v20, %v173_v21 }
 0x19e   :  { %v247_v23 = vpop.f32.mrf.mxu1 }
 0x19f   :  { %v219_v24 = vpack.c.bf16 %v174_v22, %v174_v22 }
 0x1a0   :  { %v176_v25 = vpop.f32.mrf.mxu1 }
 0x1a1   :  { %189 = vst.msk [vmem:[#allocation2] sm:$0xf] %vm188_vm3, %v219_v24  ;;  %v177_v26 = vadd.f32 %v213_v20, %v176_v25 }
 0x1a2   :  { %v248_v27 = vpop.f32.mrf.mxu1 }
 0x1a3   :  { %v220_v28 = vpack.c.bf16 %v177_v26, %v177_v26 }
 0x1a5   :  { %190 = vst.msk [vmem:[#allocation2 + $0x4] sm:$0xf] %vm188_vm3, %v220_v28 }
 0x1a6   :  { %271 = shalt.err (!%p268_p4)
}
 0x1a7   :  { %s285_s4 = smov 64   ;;  %s286_s12 = smov 4  }
 0x1a8   :  { %202 = dma.vmem_to_hbm [thread:$0]  %s197_s3, 128, %s355_s5, [#allocation3], %s285_s4, %s285_s4, %s286_s12  }
 0x1a9   :  { %280 = dma.done.wait [#allocation3], 128  }
 0x1aa   :  { %281 = vsyncadd [#allocation3], 4294967168 }
 0x1ab   :  { %206 = vsyncpa [#allocation3], 1 }

</bundles_post_ra>
